<compile_context>
chip_gen: v7x
topology: tpu7x:2x2x1
jax: 0.10.0
libtpu: 0.0.40
codegen_flags: <defaults>
</compile_context>

<pallas_src>
import jax
import jax.numpy as jnp
from jax import lax
from jax.experimental import pallas as pl
from jax.experimental.pallas import tpu as pltpu

# ---- module configuration (Downsample defaults) ----
IN_CHANNELS = 16
OUT_CHANNELS = 8
KERNEL_SIZE = 4
STRIDE = 4
LN_EPS = 1e-6


# ---------------------------------------------------------------------------
# Pallas kernel: one (batch, L-tile) step = conv-as-matmul + fused LayerNorm
# ---------------------------------------------------------------------------
def _downsample_kernel(xcol_ref, w_ref, b_ref, g_ref, be_ref, o_ref):
    xcol = xcol_ref[0]                                   # (Cin*K, Lt) — L on lanes
    # Conv1d (stride == kernel_size): a single MXU matmul, default precision.
    y = jnp.dot(w_ref[...], xcol,
                preferred_element_type=jnp.float32)      # (Cout, Lt)
    y = y + b_ref[...]                                   # (Cout, 1) lane-broadcast
    # LayerNorm over channels (sublane axis), biased variance, eps = 1e-6.
    mean = jnp.mean(y, axis=0, keepdims=True)            # (1, Lt)
    yc = y - mean
    var = jnp.mean(yc * yc, axis=0, keepdims=True)       # (1, Lt)
    inv = lax.rsqrt(var + LN_EPS)
    o_ref[0] = (yc * inv * g_ref[...] + be_ref[...]).astype(o_ref.dtype)


# ---------------------------------------------------------------------------
# Wrapper: im2col layout plumbing + BlockSpecs / grid
# ---------------------------------------------------------------------------
@jax.jit
def downsample_pallas(x, w, b, ln_gamma, ln_beta):
    """x: (B, Cin, Lin) f32 (PyTorch NCL). Returns (B, Cout, Lout) f32 in NCL."""
    B, Cin, Lin = x.shape
    Cout, _, K = w.shape
    Lout = (Lin - K) // STRIDE + 1

    # im2col so the kernel sees one lane-dense matmul operand (Cin*K, Lout).
    if STRIDE == K:
        # non-overlapping windows -> pure reshape/swapaxes
        xcol = x[:, :, :Lout * K].reshape(B, Cin, Lout, K)
        xcol = jnp.swapaxes(xcol, 2, 3).reshape(B, Cin * K, Lout)
    else:
        # general (overlapping) case via gather
        idx = jnp.arange(K)[:, None] + (jnp.arange(Lout) * STRIDE)[None, :]
        xcol = x[:, :, idx].reshape(B, Cin * K, Lout)

    w2 = w.reshape(Cout, Cin * K).astype(jnp.float32)
    b2 = b.reshape(Cout, 1).astype(jnp.float32)
    g2 = ln_gamma.reshape(Cout, 1).astype(jnp.float32)
    be2 = ln_beta.reshape(Cout, 1).astype(jnp.float32)

    # Largest lane tile that divides Lout (coarse grid; >=128 lanes per block).
    Lt = Lout
    for cand in (512, 256, 128):
        if Lout % cand == 0:
            Lt = cand
            break

    grid = (B, Lout // Lt)
    out = pl.pallas_call(
        _downsample_kernel,
        out_shape=jax.ShapeDtypeStruct((B, Cout, Lout), jnp.float32),
        grid=grid,
        in_specs=[
            pl.BlockSpec((1, Cin * K, Lt), lambda bb, ll: (bb, 0, ll)),
            pl.BlockSpec((Cout, Cin * K), lambda bb, ll: (0, 0)),
            pl.BlockSpec((Cout, 1), lambda bb, ll: (0, 0)),
            pl.BlockSpec((Cout, 1), lambda bb, ll: (0, 0)),
            pl.BlockSpec((Cout, 1), lambda bb, ll: (0, 0)),
        ],
        out_specs=pl.BlockSpec((1, Cout, Lt), lambda bb, ll: (bb, 0, ll)),
        compiler_params=pltpu.CompilerParams(
            dimension_semantics=("parallel", "parallel")),
    )(xcol.astype(jnp.float32), w2, b2, g2, be2)
    return out                                            # already NCL


# ---------------------------------------------------------------------------
# Pure-JAX reference (f32, HIGHEST precision conv)
# ---------------------------------------------------------------------------
def downsample_ref(x, w, b, ln_gamma, ln_beta):
    y = lax.conv_general_dilated(
        x, w, window_strides=(STRIDE,), padding=[(0, 0)],
        dimension_numbers=("NCH", "OIH", "NCH"),
        precision=lax.Precision.HIGHEST)
    y = y + b[None, :, None]
    yt = jnp.transpose(y, (0, 2, 1))                      # (B, Lout, Cout)
    mean = jnp.mean(yt, axis=-1, keepdims=True)
    var = jnp.mean((yt - mean) ** 2, axis=-1, keepdims=True)
    yn = (yt - mean) / jnp.sqrt(var + LN_EPS)
    yn = yn * ln_gamma[None, None, :] + ln_beta[None, None, :]
    return jnp.transpose(yn, (0, 2, 1))                   # back to (B, Cout, Lout)


if __name__ == "__main__":
    key = jax.random.PRNGKey(0)
    kx, kw, kb, kg, kbe = jax.random.split(key, 5)

    B, Lin = 2, 1024
    x = jax.random.normal(kx, (B, IN_CHANNELS, Lin), jnp.float32)
    fan_in = IN_CHANNELS * KERNEL_SIZE
    w = jax.random.normal(kw, (OUT_CHANNELS, IN_CHANNELS, KERNEL_SIZE),
                          jnp.float32) / jnp.sqrt(float(fan_in))
    b = 0.1 * jax.random.normal(kb, (OUT_CHANNELS,), jnp.float32)
    ln_gamma = 1.0 + 0.1 * jax.random.normal(kg, (OUT_CHANNELS,), jnp.float32)
    ln_beta = 0.1 * jax.random.normal(kbe, (OUT_CHANNELS,), jnp.float32)

    out = downsample_pallas(x, w, b, ln_gamma, ln_beta)
    out = jax.block_until_ready(out)

    ref = downsample_ref(x, w, b, ln_gamma, ln_beta)
    Lout = (Lin - KERNEL_SIZE) // STRIDE + 1
    assert out.shape == (B, OUT_CHANNELS, Lout), out.shape
    scale = 1.0 + float(jnp.max(jnp.abs(ref)))
    err = float(jnp.max(jnp.abs(out - ref)))
    assert err < 2e-2 * scale, (err, scale)
    print("KERNEL_OK")
</pallas_src>

<mosaic_0001>
module attributes {stable_mosaic.version = 11 : i64} {
  func.func @_downsample_kernel(%arg0: i32, %arg1: i32, %arg2: memref<1x64x256xf32, #tpu.memory_space<vmem>>, %arg3: memref<8x64xf32, #tpu.memory_space<vmem>>, %arg4: memref<8x1xf32, #tpu.memory_space<vmem>>, %arg5: memref<8x1xf32, #tpu.memory_space<vmem>>, %arg6: memref<8x1xf32, #tpu.memory_space<vmem>>, %arg7: memref<1x8x256xf32, #tpu.memory_space<vmem>>) attributes {dimension_semantics = [#tpu.dimension_semantics<parallel>, #tpu.dimension_semantics<parallel>], iteration_bounds = array<i64: 2, 1>, scalar_prefetch = 0 : i64, scratch_operands = 0 : i64, tpu.core_type = #tpu.core_type<tc>, window_params = [{transform_indices = @transform_0, window_bounds = array<i64: 1, 64, 256>}, {pipeline_mode = #tpu.pipeline_mode<synchronous>, transform_indices = @transform_1, window_bounds = array<i64: 8, 64>}, {pipeline_mode = #tpu.pipeline_mode<synchronous>, transform_indices = @transform_2, window_bounds = array<i64: 8, 1>}, {pipeline_mode = #tpu.pipeline_mode<synchronous>, transform_indices = @transform_3, window_bounds = array<i64: 8, 1>}, {pipeline_mode = #tpu.pipeline_mode<synchronous>, transform_indices = @transform_4, window_bounds = array<i64: 8, 1>}, {transform_indices = @transform_5, window_bounds = array<i64: 1, 8, 256>}]} {
    %c0 = arith.constant 0 : index
    %c0_0 = arith.constant 0 : index
    %c0_1 = arith.constant 0 : index
    %0 = vector.load %arg2[%c0, %c0_0, %c0_1] : memref<1x64x256xf32, #tpu.memory_space<vmem>>, vector<1x64x256xf32>
    %1 = vector.shape_cast %0 : vector<1x64x256xf32> to vector<64x256xf32>
    %c0_2 = arith.constant 0 : index
    %c0_3 = arith.constant 0 : index
    %2 = vector.load %arg3[%c0_2, %c0_3] : memref<8x64xf32, #tpu.memory_space<vmem>>, vector<8x64xf32>
    %cst = arith.constant dense<0.000000e+00> : vector<8x256xf32>
    %3 = tpu.matmul %2, %1, %cst {dimension_numbers = #tpu.dot_dimension_numbers<[1], [0], [0], [1], [0, 0, 1, 1], [], []>} : vector<8x64xf32>, vector<64x256xf32>, vector<8x256xf32> -> vector<8x256xf32>
    %c0_4 = arith.constant 0 : index
    %c0_5 = arith.constant 0 : index
    %4 = vector.load %arg4[%c0_4, %c0_5] : memref<8x1xf32, #tpu.memory_space<vmem>>, vector<8x1xf32>
    %5 = vector.broadcast %4 : vector<8x1xf32> to vector<8x256xf32>
    %6 = arith.addf %3, %5 : vector<8x256xf32>
    %cst_6 = arith.constant dense<0.000000e+00> : vector<256xf32>
    %7 = vector.multi_reduction <add>, %6, %cst_6 [0] : vector<8x256xf32> to vector<256xf32>
    %8 = vector.shape_cast %7 : vector<256xf32> to vector<1x256xf32>
    %cst_7 = arith.constant 8.000000e+00 : f32
    %9 = vector.broadcast %cst_7 : f32 to vector<1x256xf32>
    %10 = arith.divf %8, %9 : vector<1x256xf32>
    %11 = vector.broadcast %10 : vector<1x256xf32> to vector<8x256xf32>
    %12 = arith.subf %6, %11 : vector<8x256xf32>
    %13 = arith.mulf %12, %12 : vector<8x256xf32>
    %cst_8 = arith.constant dense<0.000000e+00> : vector<256xf32>
    %14 = vector.multi_reduction <add>, %13, %cst_8 [0] : vector<8x256xf32> to vector<256xf32>
    %15 = vector.shape_cast %14 : vector<256xf32> to vector<1x256xf32>
    %cst_9 = arith.constant 8.000000e+00 : f32
    %16 = vector.broadcast %cst_9 : f32 to vector<1x256xf32>
    %17 = arith.divf %15, %16 : vector<1x256xf32>
    %cst_10 = arith.constant 9.99999997E-7 : f32
    %18 = vector.broadcast %cst_10 : f32 to vector<1x256xf32>
    %19 = arith.addf %17, %18 : vector<1x256xf32>
    %20 = math.rsqrt %19 : vector<1x256xf32>
    %21 = vector.broadcast %20 : vector<1x256xf32> to vector<8x256xf32>
    %22 = arith.mulf %12, %21 : vector<8x256xf32>
    %c0_11 = arith.constant 0 : index
    %c0_12 = arith.constant 0 : index
    %23 = vector.load %arg5[%c0_11, %c0_12] : memref<8x1xf32, #tpu.memory_space<vmem>>, vector<8x1xf32>
    %24 = vector.broadcast %23 : vector<8x1xf32> to vector<8x256xf32>
    %25 = arith.mulf %22, %24 : vector<8x256xf32>
    %c0_13 = arith.constant 0 : index
    %c0_14 = arith.constant 0 : index
    %26 = vector.load %arg6[%c0_13, %c0_14] : memref<8x1xf32, #tpu.memory_space<vmem>>, vector<8x1xf32>
    %27 = vector.broadcast %26 : vector<8x1xf32> to vector<8x256xf32>
    %28 = arith.addf %25, %27 : vector<8x256xf32>
    %c0_15 = arith.constant 0 : index
    %c0_16 = arith.constant 0 : index
    %c0_17 = arith.constant 0 : index
    %29 = vector.load %arg7[%c0_15, %c0_16, %c0_17] : memref<1x8x256xf32, #tpu.memory_space<vmem>>, vector<1x8x256xf32>
    %30 = vector.shape_cast %29 : vector<1x8x256xf32> to vector<8x256xf32>
    %31 = vector.shape_cast %28 : vector<8x256xf32> to vector<1x8x256xf32>
    tpu.vector_store %arg7[%c0_15, %c0_16, %c0_17], %31 {strides = array<i32>} : memref<1x8x256xf32, #tpu.memory_space<vmem>>, vector<1x8x256xf32>,
    return
  }
  func.func @transform_0(%arg0: i32, %arg1: i32) -> (i32, i32, i32) {
    %c0_i32 = arith.constant 0 : i32
    %c0_i32_0 = arith.constant 0 : i32
    return %arg0, %c0_i32, %arg1 : i32, i32, i32
  }
  func.func @transform_1(%arg0: i32, %arg1: i32) -> (i32, i32) {
    %c0_i32 = arith.constant 0 : i32
    %c0_i32_0 = arith.constant 0 : i32
    %c0_i32_1 = arith.constant 0 : i32
    return %c0_i32, %c0_i32_0 : i32, i32
  }
  func.func @transform_2(%arg0: i32, %arg1: i32) -> (i32, i32) {
    %c0_i32 = arith.constant 0 : i32
    %c0_i32_0 = arith.constant 0 : i32
    %c0_i32_1 = arith.constant 0 : i32
    return %c0_i32, %c0_i32_0 : i32, i32
  }
  func.func @transform_3(%arg0: i32, %arg1: i32) -> (i32, i32) {
    %c0_i32 = arith.constant 0 : i32
    %c0_i32_0 = arith.constant 0 : i32
    %c0_i32_1 = arith.constant 0 : i32
    return %c0_i32, %c0_i32_0 : i32, i32
  }
  func.func @transform_4(%arg0: i32, %arg1: i32) -> (i32, i32) {
    %c0_i32 = arith.constant 0 : i32
    %c0_i32_0 = arith.constant 0 : i32
    %c0_i32_1 = arith.constant 0 : i32
    return %c0_i32, %c0_i32_0 : i32, i32
  }
  func.func @transform_5(%arg0: i32, %arg1: i32) -> (i32, i32, i32) {
    %c0_i32 = arith.constant 0 : i32
    %c0_i32_0 = arith.constant 0 : i32
    return %arg0, %c0_i32, %arg1 : i32, i32, i32
  }
}

</mosaic_0001>

<bundles_post_ra>
// kernel: downsample_pallas.1
= control target key start
LH: loop header
LB: loop body
LE: loop exit
PB: predicated region body
PF: predicated region fallthrough
CT: control target
= control target key end

     0   :  { %10 = vsyncpa [#allocation3], 0  ;;  %s834_s0 = inlined_call_operand.vmem [shape: f32[2,64,256], index: 0, kind: input, shape index: {}]   ;;  %s835_s1 = inlined_call_operand.vmem [shape: f32[8,64], index: 1, kind: input, shape index: {}]   ;;  %s836_s2 = inlined_call_operand.vmem [shape: f32[8,1], index: 2, kind: input, shape index: {}]   ;;  %s837_s3 = inlined_call_operand.vmem [shape: f32[8,1], index: 3, kind: input, shape index: {}]   ;;  %s838_s4 = inlined_call_operand.vmem [shape: f32[8,1], index: 4, kind: input, shape index: {}]   ;;  %s839_s5 = inlined_call_operand.hbm [shape: f32[2,8,256], index: 5, kind: output, shape index: {}]  }
   0x1   :  { %12 = vsyncpa [#allocation3 + $0x1], 0  ;;  %s710_s18 = smov 0   ;;  %s712_s19 = smov 0  }
   0x2   :  { %s714_s20 = smov 0   ;;  %s716_s21 = smov 0  }
   0x3   :  { %s718_s22 = smov 0   ;;  %s720_s23 = smov 0  }
   0x4 LB: > { %s502_s24 = sadd.s32 4294967295, %s675_s23   ;;  %s503_s25 = sadd.s32 4294967294, %s675_s23   ;;  %s675_s23 = sphi %s720_s23, %s18_s23   ;;  %s671_s22 = sphi %s718_s22, %s846_s22   ;;  %s667_s21 = sphi %s716_s21, %s845_s21   ;;  %s663_s20 = sphi %s714_s20, %s844_s20   ;;  %s659_s19 = sphi %s712_s19, %s843_s19   ;;  %s655_s18 = sphi %s710_s18, %s842_s18  }
   0x5   : > { %s30_s26 = sadd.s32 1, %s671_s22  ;;  %s151_s27 = sadd.s32 1, %s663_s20 }
   0x6   : > { %p32_p0 = scmp.ge.s32.totalorder %s30_s26, 2  ;;  %p161_p1 = scmp.ne.s32.totalorder %s663_s20, %s659_s19 }
   0x7   : > { %p162_p2 = scmp.eq.s32.totalorder %s502_s24, 1  ;;  %p167_p3 = scmp.ne.s32.totalorder %s659_s19, %s655_s18 }
   0x8   : > { %s848_s26 = smov (%p32_p0, %s30_s26), 0  ;;  %p168_p5 = scmp.eq.s32.totalorder %s503_s25, 1 }
   0x9   : > { %p750_p4 = por %p162_p2, %p161_p1  ;;  %s146_s29 = ssub.s32 %s671_s22, %s848_s26 }
   0xa   : > { %p506_p6 = scmp.ge.s32.totalorder %s675_s23, 1  ;;  %p149_p7 = scmp.eq.s32.totalorder %s146_s29, 0 }
   0xb   : > { %p757_p8 = por %p168_p5, %p167_p3  ;;  %p211_p9 = scmp.lt.s32.totalorder %s675_s23, 3 }
   0xc   : > { %s763_s6 = scalar_select %p149_p7, %s663_s20, %s151_s27  }
   0xd   : > { %p212_p10 = pnand %p506_p6, %p211_p9 }
   0xe   : > { %p244_p11 = scmp.lt.s32.totalorder (!%p212_p10), %s667_s21, 1  ;;  %v271_v0 = vld [vmem:[%s836_s2] sm:$0xff] (!%p212_p10)  ;;  %v677_v1 = vmov (!%p212_p10), 0.0   ;;  %v678_v2 = vmov (!%p212_p10), 0   ;;  %vm277_vm0 = vcmask (!%p212_p10), 523264   ;;  %s240_s27 = sand.u32 (!%p212_p10), 1, %s659_s19  }
   0xf   : > { %215 = sbr.rel (%p212_p10) target bundleno = 325 (0x145), region = 40  ;;  %345 = vmatprep.mubr.f32.mxu0 (!%p212_p10), %v677_v1  ;;  %591 = vset.pattern.permute.xlu0 (!%p212_p10), %v678_v2  ;;  %v399_v3 = vld [vmem:[%s838_s4] sm:$0xff] (!%p212_p10)  ;;  %s507_s29 = sshll.u32 (!%p212_p10), %s240_s27, 4 }
  0x10   : > { %274 = vperm.xlu0 (!%p212_p10), %591, %v271_v0   ;;  %592 = vset.pattern.permute.xlu1 (!%p212_p10), %v678_v2  ;;  %v391_v4 = vld [vmem:[%s837_s3] sm:$0xff] (!%p212_p10)  ;;  %s517_s7 = sshll.u32 (!%p212_p10), %s667_s21, 8  ;;  %s242_s8 = scalar_lea.vmem (!%p212_p10), [#allocation2], %s507_s29 }
  0x11   : > { %402 = vperm.xlu1 (!%p212_p10), %592, %v399_v3   ;;  %v270_v29 = vld [vmem:[%s835_s1] sm:$0xff] (!%p212_p10)  ;;  %s426_s9 = sshll.u32 (!%p212_p10), %s242_s8, 4  ;;  %s787_s12 = scalar_lea.hbm (!%p212_p10), %s839_s5, %s517_s7  ;;  %s789_s9 = int_to_ptr.vmem [resolvable:$true] %s426_s9 }
  0x12   : > { %s410_s13 = scalar_lea.sflag (!%p212_p10), [#allocation3], %s240_s27 }
  0x14   : > { %394 = vperm.xlu0 (!%p212_p10), %591, %v391_v4  }
  0x16   : > { %s245_s11 = scalar_select %p244_p11, %s667_s21, 1 }
  0x17   : > { %s679_s21 = smov [#allocation2]  }
  0x18   : > { %s516_s14 = sshll.u32 %s245_s11, 7  ;;  %s601_s15 = sshll.u32 %s679_s21, 4  ;;  %s602_s15 = int_to_ptr.vmem [resolvable:$false] %s601_s15 }
  0x19   : > { %s251_s17 = scalar_lea.vmem %s834_s0, %s516_s14  ;;  %s597_s14 = scalar_lea.vmem %s789_s9, 256 }
  0x1a   : > { %v255_v5 = vld [vmem:[%s251_s17 + $0x8] sm:$0xff]  ;;  %v257_v6 = vld [vmem:[%s251_s17 + $0x18] sm:$0xff]  ;;  %v254_v7 = vld [vmem:[%s251_s17] sm:$0xff]  ;;  %p598_p12 = scmp.ne.s32.totalorder %s789_s9, %s597_s14  ;;  %s603_s16 = scalar_lea.vmem %s602_s15, 512 }
  0x1b   : > { %v518_v8 = vpack.c.bf16 %v257_v6, %v255_v5  ;;  %v256_v9 = vld [vmem:[%s251_s17 + $0x10] sm:$0xff]  ;;  %v259_v10 = vld [vmem:[%s251_s17 + $0x28] sm:$0xff]  ;;  %v261_v11 = vld [vmem:[%s251_s17 + $0x38] sm:$0xff]  ;;  %p604_p1 = scmp.lt.s32.totalorder %s789_s9, %s602_s15  ;;  %p605_p2 = scmp.lt.s32.totalorder %s603_s16, %s597_s14 }
  0x1c   : > { %v520_v12 = vpack.c.bf16 %v256_v9, %v254_v7  ;;  %v522_v13 = vpack.c.bf16 %v261_v11, %v259_v10  ;;  %v258_v14 = vld [vmem:[%s251_s17 + $0x20] sm:$0xff]  ;;  %v260_v15 = vld [vmem:[%s251_s17 + $0x30] sm:$0xff]  ;;  %v263_v16 = vld [vmem:[%s251_s17 + $0x48] sm:$0xff]  ;;  %p599_p13 = pnand %p598_p12, %p750_p4 }
  0x1d   : > { %519 = vmatprep.subr.bf16.mxu0 %v518_v8  ;;  %v265_v17 = vld [vmem:[%s251_s17 + $0x58] sm:$0xff]  ;;  %v524_v18 = vpack.c.bf16 %v260_v15, %v258_v14  ;;  %v262_v20 = vld [vmem:[%s251_s17 + $0x40] sm:$0xff]  ;;  %v264_v21 = vld [vmem:[%s251_s17 + $0x50] sm:$0xff]  ;;  %p606_p3 = por %p605_p2, %p604_p1 }
  0x1e   : > { %521 = vmatpush1.bf16.msra.mxu0 %v520_v12  ;;  %v526_v19 = vpack.c.bf16 %v265_v17, %v263_v16  ;;  %v267_v22 = vld [vmem:[%s251_s17 + $0x68] sm:$0xff]  ;;  %v269_v23 = vld [vmem:[%s251_s17 + $0x78] sm:$0xff]  ;;  %v528_v24 = vpack.c.bf16 %v264_v21, %v262_v20  ;;  %v266_v26 = vld [vmem:[%s251_s17 + $0x60] sm:$0xff]  ;;  %p600_p0 = pneg %p599_p13 }
  0x1f   : > { %523 = vmatprep.subr.bf16.mxu0 %v522_v13  ;;  %v530_v25 = vpack.c.bf16 %v269_v23, %v267_v22  ;;  %v268_v27 = vld [vmem:[%s251_s17 + $0x70] sm:$0xff] }
  0x20   : > { %v532_v28 = vpack.c.bf16 %v268_v27, %v266_v26  ;;  %p607_p5 = pnand %p606_p3, %p600_p0 }
  0x22   : > { %525 = vmatpush1.bf16.msra.mxu0 %v524_v18 }
  0x23   : > { %527 = vmatprep.subr.bf16.mxu0 %v526_v19 }
  0x26   : > { %529 = vmatpush1.bf16.msra.mxu0 %v528_v24 }
  0x27   : > { %531 = vmatprep.subr.bf16.mxu0 %v530_v25 }
  0x2a   : > { %533 = vmatpush1.bf16.msra.mxu0 %v532_v28 }
  0x2d   : > { %510 = vmatmul.mubr.msk.f32.vlgmr.msra.gmra.mrb[0].mxu0 %vm277_vm0, %v270_v29 }
  0x8f   : > { %v275_v30 = vpop.permute.xlu0 %274 }
  0x90   : > { %v403_v9 = vpop.permute.xlu1 %402 }
  0x93   : > { %v395_v8 = vpop.permute.xlu0 %394 }
 0x100   : > { %v347_v31 = vpop.f32.mrb[0].mxu0 }
 0x101   : > { %v348_v32 = vadd.f32 %v347_v31, %v275_v30  ;;  %v349_v33 = vpop.f32.mrb[1].mxu0 }
 0x102   : > { %v350_v34 = vadd.f32 %v349_v33, %v275_v30 }
 0x103   : > { %v352_v35 = vrot.slane %v348_v32, 4 }
 0x104   : > { %v358_v36 = vrot.slane %v350_v34, 4 }
 0x105   : > { %v353_v37 = vadd.f32 %v352_v35, %v348_v32 }
 0x106   : > { %v359_v38 = vadd.f32 %v358_v36, %v350_v34 }
 0x107   : > { %v354_v39 = vrot.slane %v353_v37, 2 }
 0x108   : > { %v360_v40 = vrot.slane %v359_v38, 2 }
 0x109   : > { %v355_v41 = vadd.f32 %v354_v39, %v353_v37 }
 0x10a   : > { %v361_v42 = vadd.f32 %v360_v40, %v359_v38 }
 0x10b   : > { %v356_v43 = vrot.slane %v355_v41, 1 }
 0x10c   : > { %v362_v44 = vrot.slane %v361_v42, 1 }
 0x10d   : > { %v357_v45 = vadd.f32 %v356_v43, %v355_v41 }
 0x10e   : > { %v363_v46 = vadd.f32 %v362_v44, %v361_v42 }
 0x10f   : > { %v365_v47 = vmul.f32 0.125, %v357_v45 }
 0x110   : > { %v366_v48 = vmul.f32 0.125, %v363_v46 }
 0x111   : > { %v367_v49 = vsub.f32 %v348_v32, %v365_v47 }
 0x112   : > { %v368_v50 = vsub.f32 %v350_v34, %v366_v48 }
 0x113   : > { %v369_v51 = vmul.f32 %v367_v49, %v367_v49 }
 0x114   : > { %v370_v52 = vmul.f32 %v368_v50, %v368_v50 }
 0x115   : > { %v371_v53 = vrot.slane %v369_v51, 4 }
 0x116   : > { %v377_v54 = vrot.slane %v370_v52, 4 }
 0x117   : > { %v372_v55 = vadd.f32 %v371_v53, %v369_v51 }
 0x118   : > { %v378_v56 = vadd.f32 %v377_v54, %v370_v52 }
 0x119   : > { %v373_v57 = vrot.slane %v372_v55, 2 }
 0x11a   : > { %v379_v58 = vrot.slane %v378_v56, 2 }
 0x11b   : > { %v374_v59 = vadd.f32 %v373_v57, %v372_v55 }
 0x11c   : > { %v380_v60 = vadd.f32 %v379_v58, %v378_v56 }
 0x11d   : > { %v375_v61 = vrot.slane %v374_v59, 1 }
 0x11e   : > { %v381_v62 = vrot.slane %v380_v60, 1 }
 0x11f   : > { %v376_v63 = vadd.f32 %v375_v61, %v374_v59 }
 0x120   : > { %v382_v0 = vadd.f32 %v381_v62, %v380_v60 }
 0x121   : > { %v383_v1 = vmul.f32 0.125, %v376_v63 }
 0x122   : > { %v384_v2 = vmul.f32 0.125, %v382_v0 }
 0x123   : > { %v385_v3 = vadd.f32 1e-06, %v383_v1 }
 0x124   : > { %v386_v4 = vadd.f32 1e-06, %v384_v2 }
 0x125   : > { %593 = vrsqrt.f32 %v385_v3 }
 0x126   : > { %595 = vrsqrt.f32 %v386_v4 }
 0x12f   : > { %v594_v5 = vpop.eup %593 }
 0x130   : > { %v596_v6 = vpop.eup %595  ;;  %v389_v7 = vmul.f32 %v594_v5, %v367_v49 }
 0x131   : > { %v390_v10 = vmul.f32 %v596_v6, %v368_v50 }
 0x132   : > { %v397_v11 = vmul.f32 %v395_v8, %v389_v7 }
 0x133   : > { %v398_v12 = vmul.f32 %v395_v8, %v390_v10 }
 0x134   : > { %v405_v13 = vadd.f32 %v403_v9, %v397_v11 }
 0x135   : > { %v406_v14 = vadd.f32 %v403_v9, %v398_v12 }
 0x136   : > { %407 = vst [vmem:[%s242_s8] sm:$0xff] %v405_v13 }
 0x137   : > { %408 = vst [vmem:[%s242_s8 + $0x8] sm:$0xff] %v406_v14 }
 0x138   : > { %610 = shalt.err (!%p607_p5)
}
 0x139   : > { %s611_s17 = scalar_lea.hbm %s787_s12, 256  ;;  %s615_s27 = scalar_lea.hbm %s839_s5, 512 }
 0x13a   : > { %p612_p6 = scmp.ne.s32.totalorder %s787_s12, %s611_s17  ;;  %p616_p10 = scmp.lt.u32.totalorder %s787_s12, %s839_s5 }
 0x13b   : > { %p617_p11 = scmp.lt.u32.totalorder %s615_s27, %s611_s17  ;;  %p619_p13 = scmp.lt.u32.totalorder %s611_s17, %s787_s12 }
 0x13c   : > { %p613_p7 = pnand %p612_p6, %p750_p4 }
 0x13d   : > { %p618_p12 = por %p617_p11, %p616_p10 }
 0x13e   : > { %p614_p9 = pneg %p613_p7 }
 0x13f   : > { %p620_p0 = por %p619_p13, %p618_p12 }
 0x141   : > { %p621_p1 = pnand %p620_p0, %p614_p9 }
 0x143   : > { %624 = shalt.err (!%p621_p1)
}
 0x144   : > { %534 = dma.vmem_to_hbm [thread:$0]  (%p750_p4), %s789_s9, 256, %s787_s12, %s410_s13  }
 0x145 PF: > { %p540_p2 = scmp.ge.s32.totalorder %s675_s23, 2  ;;  %s438_s8 = sand.u32 1, %s655_s18  }
 0x146   : > { %s439_s10 = scalar_lea.sflag [#allocation3], %s438_s8 }
 0x147   : > { %p537_p3 = pnand %p540_p2, %p757_p8 }
 0x149   : > { %650 = dma.done.wait (!%p537_p3), %s439_s10, 256  }
 0x14a   : > { %652 = vsyncadd (!%p537_p3), %s439_s10, 4294967040  ;;  %s18_s23 = sadd.s32 1, %s675_s23   ;;  %s842_s18 = smov %s659_s19 }
 0x14b   : > { %p15_p5 = scmp.ge.s32.totalorder %s18_s23, 4   ;;  %s843_s19 = smov %s663_s20 }
 0x14c   : > { %s844_s20 = smov %s763_s6  ;;  %s845_s21 = smov %s671_s22 }
 0x14d   : > { %s846_s22 = smov %s848_s26  ;;  %17 = sbr.rel (!%p15_p5) target bundleno = 4 (0x4), region = 75 }
 0x154   :  { %444 = vsyncpa [#allocation3], 1 }
 0x155   :  { %446 = vsyncpa [#allocation3 + $0x1], 1 }

</bundles_post_ra>
